<compile_context>
chip_gen: v7x
topology: tpu7x:2x2x1
jax: 0.10.0
libtpu: 0.0.40
codegen_flags: <defaults>
</compile_context>

<pallas_src>
import functools
import math

import jax
import jax.numpy as jnp
from jax import lax
from jax.experimental import pallas as pl
from jax.experimental.pallas import tpu as pltpu


def _trilinear_kernel(m1_ref, m2_ref, w_ref, out_ref, xfac_ref, wx_ref, *,
                      op_dtype, precision):
    # Grid = (B, T1-tiles, T2-tiles).
    # NOTE: axis 2 (the j / T2-tile axis) MUST stay the innermost "arbitrary"
    # grid axis: xfac_ref and wx_ref are written at j == 0 and carried across
    # the rest of the j sweep for the same (b, i).
    #
    # m1_ref : (1, tm, D)      m2_ref : (1, tn, D)
    # w_ref  : (3, D) f32  = [x_w ; y_w ; dot_w]
    # out_ref: (1, tm, tn)
    # xfac_ref: (tm, 1) f32 scratch     wx_ref: (tm, D) op_dtype scratch
    yw = w_ref[1:2, :].astype(jnp.float32)                        # (1, D)

    @pl.when(pl.program_id(2) == 0)
    def _():
        # Row bias and dot-weighted LHS depend only on (b, i): compute once
        # per i-tile (in f32), reuse for every j tile.
        x1 = m1_ref[0].astype(jnp.float32)                        # (tm, D)
        xw = w_ref[0:1, :].astype(jnp.float32)                    # (1, D)
        dw = w_ref[2:3, :].astype(jnp.float32)                    # (1, D)
        xfac_ref[...] = jnp.sum(x1 * xw, axis=-1, keepdims=True)  # (tm, 1)
        wx_ref[...] = (x1 * dw).astype(wx_ref.dtype)              # (tm, D)

    x2 = m2_ref[0]                                                # (tn, D)
    if x2.dtype != op_dtype:
        x2 = x2.astype(op_dtype)

    # Column bias, lane-major: (1, D) x (tn, D)^T -> (1, tn). Rides on the MXU
    # (a handful of extra passes) instead of an XLU reduce + transpose per j.
    y_fac = lax.dot_general(
        yw.astype(op_dtype), x2,
        dimension_numbers=(((1,), (1,)), ((), ())),
        precision=precision,
        preferred_element_type=jnp.float32)                       # (1, tn)

    # Main similarity tile: contract the RHS feature axis directly (no
    # materialized transpose of m2).
    dot = lax.dot_general(
        wx_ref[...], x2,
        dimension_numbers=(((1,), (1,)), ((), ())),
        precision=precision,
        preferred_element_type=jnp.float32)                       # (tm, tn)

    out_ref[0] = (dot + xfac_ref[...] + y_fac).astype(out_ref.dtype)


def _round_up(x, m):
    return ((x + m - 1) // m) * m


def _vmem_bytes(tm, tn, d, in_bytes, out_bytes, op_bytes):
    """Conservative per-step VMEM working set including the sublane/lane
    padding Mosaic applies to every block and scratch buffer."""
    d_pad = _round_up(d, 128)
    tm_p = _round_up(tm, 8)
    tn_lane = _round_up(tn, 128)
    tn_sub = _round_up(tn, 8)
    m1 = 2 * tm_p * d_pad * in_bytes          # double-buffered even though constant in j
    m2 = 2 * tn_sub * d_pad * in_bytes
    w = 2 * 8 * d_pad * 4                     # (3, D) f32 pads to (8, d_pad)
    out = 2 * tm_p * tn_lane * out_bytes
    xfac = tm_p * 128 * 4                     # (tm, 1) lane-pads to (tm, 128)
    wx = tm_p * d_pad * op_bytes              # hoisted weighted_x scratch
    return m1 + m2 + w + out + xfac + wx


def _fit_dim(total, preferred, align):
    """Tile along one dim: the full extent if it is <= preferred (always a
    legal block), otherwise the largest multiple of `align` <= preferred."""
    if total <= preferred:
        return total
    return max(align, (preferred // align) * align)


def _shrink(t, align):
    return max(align, ((t // 2) // align) * align)


def _pick_tiles(t1, t2, d, in_bytes, out_bytes, op_bytes, sub, vmem_budget):
    # Generous start (bigger on 128 MiB-VMEM v5e/v6e, smaller on 64 MiB v7x),
    # then shrink until the padded working set fits the budget.
    tm = _fit_dim(t1, 2048 if vmem_budget >= (48 << 20) else 1024, sub)
    tn = _fit_dim(t2, 512, 128)
    while _vmem_bytes(tm, tn, d, in_bytes, out_bytes, op_bytes) > vmem_budget:
        if tm >= tn and tm > sub:
            tm = _shrink(tm, sub)
        elif tn > 128:
            tn = _shrink(tn, 128)
        elif tm > sub:
            tm = _shrink(tm, sub)
        else:
            # TODO(synk): for very large D add a k (D-tiling) grid axis with an
            # f32 accumulator scratch instead of bottoming out at (8, 128) tiles.
            break
    return tm, tn


def tri_linear_attention(matrix_1, matrix_2, x_weights, y_weights, dot_weights,
                         *, tm=None, tn=None, use_bf16_mxu=None, out_dtype=None):
    """matrix_1: (B, T1, D), matrix_2: (B, T2, D) -> (B, T1, T2)."""
    B, T1, D = matrix_1.shape
    B2, T2, D2 = matrix_2.shape
    assert B2 == B and D2 == D, "matrix_1/matrix_2 shape mismatch"

    in_dtype = matrix_1.dtype
    if out_dtype is None:
        out_dtype = in_dtype
    if use_bf16_mxu is None:
        # bf16 inputs go straight to the bf16-native MXU; f32 inputs keep the
        # exact f32 path (matches the torch module) unless explicitly opted in.
        use_bf16_mxu = (in_dtype == jnp.bfloat16)
    op_dtype = jnp.bfloat16 if use_bf16_mxu else jnp.float32
    precision = (lax.Precision.DEFAULT if op_dtype == jnp.bfloat16
                 else lax.Precision.HIGHEST)

    in_bytes = jnp.dtype(in_dtype).itemsize
    out_bytes = jnp.dtype(out_dtype).itemsize
    op_bytes = jnp.dtype(op_dtype).itemsize
    sub = 8 if in_bytes >= 4 else 16          # sublane alignment (16 for bf16)

    try:
        vmem_cap = int(pltpu.get_tpu_info().vmem_capacity_bytes)
    except Exception:
        vmem_cap = 64 << 20                   # be conservative (v7x-sized)
    vmem_budget = vmem_cap // 2               # headroom for compiler scratch

    auto_tm, auto_tn = _pick_tiles(T1, T2, D, in_bytes, out_bytes, op_bytes,
                                   sub, vmem_budget)
    tm = auto_tm if tm is None else tm
    tn = auto_tn if tn is None else tn

    # Pack the three weight vectors into one lane-major (3, D) f32 block.
    # (x_weights: (D,1), y_weights: (D,1), dot_weights: (1,1,D) in the module.)
    w = jnp.concatenate(
        [jnp.asarray(x_weights, jnp.float32).reshape(1, D),
         jnp.asarray(y_weights, jnp.float32).reshape(1, D),
         jnp.asarray(dot_weights, jnp.float32).reshape(1, D)], axis=0)

    grid = (B, pl.cdiv(T1, tm), pl.cdiv(T2, tn))

    working_set = _vmem_bytes(tm, tn, D, in_bytes, out_bytes, op_bytes)
    vmem_limit = int(min(max(working_set * 5 // 4 + (2 << 20), 16 << 20),
                         vmem_cap * 7 // 8))

    kernel = functools.partial(_trilinear_kernel, op_dtype=op_dtype,
                               precision=precision)

    return pl.pallas_call(
        kernel,
        out_shape=jax.ShapeDtypeStruct((B, T1, T2), out_dtype),
        grid_spec=pltpu.PrefetchScalarGridSpec(
            num_scalar_prefetch=0,
            grid=grid,
            in_specs=[
                pl.BlockSpec((1, tm, D), lambda b, i, j: (b, i, 0)),
                pl.BlockSpec((1, tn, D), lambda b, i, j: (b, j, 0)),
                pl.BlockSpec((3, D), lambda b, i, j: (0, 0)),
            ],
            out_specs=pl.BlockSpec((1, tm, tn), lambda b, i, j: (b, i, j)),
            scratch_shapes=[
                pltpu.VMEM((tm, 1), jnp.float32),   # row bias, carried over j
                pltpu.VMEM((tm, D), op_dtype),      # hoisted weighted_x
            ],
        ),
        compiler_params=pltpu.CompilerParams(
            # j carries the per-(b,i) scratches -> must stay "arbitrary" and
            # innermost; B and the i-tile axis shard across TensorCores.
            dimension_semantics=("parallel", "parallel", "arbitrary"),
            vmem_limit_bytes=vmem_limit,
        ),
    )(matrix_1, matrix_2, w)


def init_params(key, input_dim):
    """Deterministic init matching reset_parameters(): U(-std, std),
    std = sqrt(6 / (3*input_dim + 1))."""
    std = math.sqrt(6.0 / (input_dim * 3 + 1))
    kx, ky, kd = jax.random.split(key, 3)
    x_w = jax.random.uniform(kx, (input_dim, 1), jnp.float32, -std, std)
    y_w = jax.random.uniform(ky, (input_dim, 1), jnp.float32, -std, std)
    dot_w = jax.random.uniform(kd, (1, 1, input_dim), jnp.float32, -std, std)
    return x_w, y_w, dot_w


def reference(matrix_1, matrix_2, x_w, y_w, dot_w):
    """Pure-JAX reference reproducing the torch forward exactly (f32)."""
    B, T1, D = matrix_1.shape
    T2 = matrix_2.shape[1]
    hp = lax.Precision.HIGHEST
    x_factors = jnp.matmul(matrix_1.reshape(B * T1, D), x_w,
                           precision=hp).reshape(B, T1, 1)
    y_factors = jnp.matmul(matrix_2.reshape(B * T2, D), y_w,
                           precision=hp).reshape(B, 1, T2)
    weighted_x = matrix_1 * dot_w
    dot_factors = jnp.einsum("bid,bjd->bij", weighted_x, matrix_2, precision=hp)
    return dot_factors + x_factors + y_factors


if __name__ == "__main__":
    key = jax.random.PRNGKey(0)
    k1, k2, kp = jax.random.split(key, 3)

    B, T1, T2, D = 2, 16, 8, 32
    matrix_1 = jax.random.normal(k1, (B, T1, D), jnp.float32)
    matrix_2 = jax.random.normal(k2, (B, T2, D), jnp.float32)
    x_w, y_w, dot_w = init_params(kp, D)

    out = tri_linear_attention(matrix_1, matrix_2, x_w, y_w, dot_w)
    out = jax.block_until_ready(out)

    ref = reference(matrix_1, matrix_2, x_w, y_w, dot_w)
    assert out.shape == (B, T1, T2)
    assert jnp.allclose(out, ref, atol=1e-4, rtol=1e-4), "mismatch vs reference"

    print("KERNEL_OK")
</pallas_src>

<mosaic_0001>
module attributes {stable_mosaic.version = 11 : i64} {
  func.func @_trilinear_kernel(%arg0: i32, %arg1: i32, %arg2: i32, %arg3: memref<1x16x32xf32, #tpu.memory_space<vmem>>, %arg4: memref<1x8x32xf32, #tpu.memory_space<vmem>>, %arg5: memref<3x32xf32, #tpu.memory_space<vmem>>, %arg6: memref<1x16x8xf32, #tpu.memory_space<vmem>>, %arg7: memref<16x1xf32, #tpu.memory_space<vmem>>, %arg8: memref<16x32xf32, #tpu.memory_space<vmem>>) attributes {dimension_semantics = [#tpu.dimension_semantics<parallel>, #tpu.dimension_semantics<parallel>, #tpu.dimension_semantics<arbitrary>], iteration_bounds = array<i64: 2, 1, 1>, scalar_prefetch = 0 : i64, scratch_operands = 2 : i64, tpu.core_type = #tpu.core_type<tc>, window_params = [{transform_indices = @transform_0, window_bounds = array<i64: 1, 16, 32>}, {transform_indices = @transform_1, window_bounds = array<i64: 1, 8, 32>}, {pipeline_mode = #tpu.pipeline_mode<synchronous>, transform_indices = @transform_2, window_bounds = array<i64: 3, 32>}, {transform_indices = @transform_3, window_bounds = array<i64: 1, 16, 8>}]} {
    %c1 = arith.constant 1 : index
    %c0 = arith.constant 0 : index
    %0 = vector.load %arg5[%c1, %c0] : memref<3x32xf32, #tpu.memory_space<vmem>>, vector<1x32xf32>
    %c0_i32 = arith.constant 0 : i32
    %1 = arith.cmpi eq, %arg2, %c0_i32 : i32
    %2 = arith.extui %1 : i1 to i32
    %c0_i32_0 = arith.constant 0 : i32
    %3 = arith.cmpi ne, %2, %c0_i32_0 : i32
    scf.if %3 {
      %c0_12 = arith.constant 0 : index
      %c0_13 = arith.constant 0 : index
      %c0_14 = arith.constant 0 : index
      %17 = vector.load %arg3[%c0_12, %c0_13, %c0_14] : memref<1x16x32xf32, #tpu.memory_space<vmem>>, vector<1x16x32xf32>
      %18 = vector.shape_cast %17 : vector<1x16x32xf32> to vector<16x32xf32>
      %c0_15 = arith.constant 0 : index
      %c0_16 = arith.constant 0 : index
      %19 = vector.load %arg5[%c0_15, %c0_16] : memref<3x32xf32, #tpu.memory_space<vmem>>, vector<1x32xf32>
      %c2 = arith.constant 2 : index
      %c0_17 = arith.constant 0 : index
      %20 = vector.load %arg5[%c2, %c0_17] : memref<3x32xf32, #tpu.memory_space<vmem>>, vector<1x32xf32>
      %21 = vector.broadcast %19 : vector<1x32xf32> to vector<16x32xf32>
      %22 = arith.mulf %18, %21 : vector<16x32xf32>
      %cst_18 = arith.constant dense<0.000000e+00> : vector<16xf32>
      %23 = vector.multi_reduction <add>, %22, %cst_18 [1] : vector<16x32xf32> to vector<16xf32>
      %24 = vector.shape_cast %23 : vector<16xf32> to vector<16x1xf32>
      %c0_19 = arith.constant 0 : index
      %c0_20 = arith.constant 0 : index
      %25 = vector.load %arg7[%c0_19, %c0_20] : memref<16x1xf32, #tpu.memory_space<vmem>>, vector<16x1xf32>
      tpu.vector_store %arg7[%c0_19, %c0_20], %24 {strides = array<i32>} : memref<16x1xf32, #tpu.memory_space<vmem>>, vector<16x1xf32>,
      %26 = vector.broadcast %20 : vector<1x32xf32> to vector<16x32xf32>
      %27 = arith.mulf %18, %26 : vector<16x32xf32>
      %c0_21 = arith.constant 0 : index
      %c0_22 = arith.constant 0 : index
      %28 = vector.load %arg8[%c0_21, %c0_22] : memref<16x32xf32, #tpu.memory_space<vmem>>, vector<16x32xf32>
      tpu.vector_store %arg8[%c0_21, %c0_22], %27 {strides = array<i32>} : memref<16x32xf32, #tpu.memory_space<vmem>>, vector<16x32xf32>,
    } else {
    }
    %c0_1 = arith.constant 0 : index
    %c0_2 = arith.constant 0 : index
    %c0_3 = arith.constant 0 : index
    %4 = vector.load %arg4[%c0_1, %c0_2, %c0_3] : memref<1x8x32xf32, #tpu.memory_space<vmem>>, vector<1x8x32xf32>
    %5 = vector.shape_cast %4 : vector<1x8x32xf32> to vector<8x32xf32>
    %cst = arith.constant dense<0.000000e+00> : vector<1x8xf32>
    %6 = tpu.matmul %0, %5, %cst {dimension_numbers = #tpu.dot_dimension_numbers<[1], [1], [0], [0], [0, 0, 1, 0], [], []>, precision = #tpu.contract_precision<fp32>} : vector<1x32xf32>, vector<8x32xf32>, vector<1x8xf32> -> vector<1x8xf32>
    %c0_4 = arith.constant 0 : index
    %c0_5 = arith.constant 0 : index
    %7 = vector.load %arg8[%c0_4, %c0_5] : memref<16x32xf32, #tpu.memory_space<vmem>>, vector<16x32xf32>
    %cst_6 = arith.constant dense<0.000000e+00> : vector<16x8xf32>
    %8 = tpu.matmul %7, %5, %cst_6 {dimension_numbers = #tpu.dot_dimension_numbers<[1], [1], [0], [0], [0, 0, 1, 0], [], []>, precision = #tpu.contract_precision<fp32>} : vector<16x32xf32>, vector<8x32xf32>, vector<16x8xf32> -> vector<16x8xf32>
    %c0_7 = arith.constant 0 : index
    %c0_8 = arith.constant 0 : index
    %9 = vector.load %arg7[%c0_7, %c0_8] : memref<16x1xf32, #tpu.memory_space<vmem>>, vector<16x1xf32>
    %10 = vector.broadcast %9 : vector<16x1xf32> to vector<16x8xf32>
    %11 = arith.addf %8, %10 : vector<16x8xf32>
    %12 = vector.broadcast %6 : vector<1x8xf32> to vector<16x8xf32>
    %13 = arith.addf %11, %12 : vector<16x8xf32>
    %c0_9 = arith.constant 0 : index
    %c0_10 = arith.constant 0 : index
    %c0_11 = arith.constant 0 : index
    %14 = vector.load %arg6[%c0_9, %c0_10, %c0_11] : memref<1x16x8xf32, #tpu.memory_space<vmem>>, vector<1x16x8xf32>
    %15 = vector.shape_cast %14 : vector<1x16x8xf32> to vector<16x8xf32>
    %16 = vector.shape_cast %13 : vector<16x8xf32> to vector<1x16x8xf32>
    tpu.vector_store %arg6[%c0_9, %c0_10, %c0_11], %16 {strides = array<i32>} : memref<1x16x8xf32, #tpu.memory_space<vmem>>, vector<1x16x8xf32>,
    return
  }
  func.func @transform_0(%arg0: i32, %arg1: i32, %arg2: i32) -> (i32, i32, i32) {
    %c0_i32 = arith.constant 0 : i32
    %c0_i32_0 = arith.constant 0 : i32
    return %arg0, %arg1, %c0_i32 : i32, i32, i32
  }
  func.func @transform_1(%arg0: i32, %arg1: i32, %arg2: i32) -> (i32, i32, i32) {
    %c0_i32 = arith.constant 0 : i32
    %c0_i32_0 = arith.constant 0 : i32
    return %arg0, %arg2, %c0_i32 : i32, i32, i32
  }
  func.func @transform_2(%arg0: i32, %arg1: i32, %arg2: i32) -> (i32, i32) {
    %c0_i32 = arith.constant 0 : i32
    %c0_i32_0 = arith.constant 0 : i32
    %c0_i32_1 = arith.constant 0 : i32
    return %c0_i32, %c0_i32_0 : i32, i32
  }
  func.func @transform_3(%arg0: i32, %arg1: i32, %arg2: i32) -> (i32, i32, i32) {
    %c0_i32 = arith.constant 0 : i32
    return %arg0, %arg1, %arg2 : i32, i32, i32
  }
}

</mosaic_0001>

<bundles_post_ra>
// kernel: tpu_custom_call.1
= control target key start
LH: loop header
LB: loop body
LE: loop exit
PB: predicated region body
PF: predicated region fallthrough
CT: control target
= control target key end

     0   :  { %8 = vsyncpa [#allocation5], 0  ;;  %s1970_s0 = inlined_call_operand.hbm [shape: f32[2,16,32], index: 0, kind: input, shape index: {}]   ;;  %s1971_s1 = inlined_call_operand.hbm [shape: f32[2,8,32], index: 1, kind: input, shape index: {}]   ;;  %s1972_s2 = inlined_call_operand.vmem [shape: f32[3,32], index: 2, kind: input, shape index: {}]   ;;  %s1973_s3 = inlined_call_operand.vmem [shape: f32[2,16,8], index: 3, kind: output, shape index: {}]  }
   0x1   :  { %10 = vsyncpa [#allocation5 + $0x1], 0 }
   0x2   :  { %11 = vsyncpa [#allocation7], 0 }
   0x3   :  { %13 = vsyncpa [#allocation7 + $0x1], 0  ;;  %s1753_s12 = smov 0   ;;  %s1755_s13 = smov 0  }
   0x4   :  { %s1757_s14 = smov 0   ;;  %s1759_s15 = smov 0  }
   0x5   :  { %s1761_s16 = smov 0   ;;  %s1763_s17 = smov 0  }
   0x6 LB: > { %s1411_s18 = sadd.s32 4294967295, %s1724_s17   ;;  %s38_s19 = sadd.s32 1, %s1720_s16  ;;  %s1724_s17 = sphi %s1763_s17, %s19_s17   ;;  %s1720_s16 = sphi %s1761_s16, %s1985_s16   ;;  %s1716_s15 = sphi %s1759_s15, %s1984_s15   ;;  %s1712_s14 = sphi %s1757_s14, %s1983_s14   ;;  %s1708_s13 = sphi %s1755_s13, %s1982_s13   ;;  %s1704_s12 = sphi %s1753_s12, %s1981_s12  }
   0x7   : > { %p40_p0 = scmp.ge.s32.totalorder %s38_s19, 2  ;;  %s47_s20 = sadd.s32 1, %s1712_s14 }
   0x8   : > { %p54_p1 = scmp.ne.s32.totalorder %s1712_s14, %s1708_s13  ;;  %p55_p2 = scmp.eq.s32.totalorder %s1724_s17, 0 }
   0x9   : > { %s1987_s19 = smov (%p40_p0, %s38_s19), 0  ;;  %p60_p4 = scmp.ne.s32.totalorder %s1708_s13, %s1704_s12 }
   0xa   : > { %p1789_p3 = por %p55_p2, %p54_p1  ;;  %s42_s22 = ssub.s32 %s1720_s16, %s1987_s19 }
   0xb   : > { %p61_p5 = scmp.eq.s32.totalorder %s1411_s18, 0  ;;  %p45_p6 = scmp.eq.s32.totalorder %s42_s22, 0 }
   0xc   : > { %p1554_p8 = scmp.lt.s32.totalorder %s1724_s17, 2  ;;  %s1805_s25 = sand.u32 1, %s1712_s14  }
   0xd   : > { %p1796_p7 = por %p61_p5, %p60_p4  ;;  %s1429_s26 = sshll.u32 %s1720_s16, 8 }
   0xe   : > { %s1802_s24 = scalar_select %p45_p6, %s1712_s14, %s47_s20  }
   0xf   : > { %s1976_s23 = scalar_select %p1796_p7, 1, 0 }
  0x10   : > { %s1415_s27 = sshll.u32 %s1805_s25, 4  ;;  %s1812_s30 = scalar_lea.hbm %s1970_s0, %s1429_s26 }
  0x11   : > { %s170_s4 = scalar_lea.vmem [#allocation4], %s1415_s27  ;;  %p1816_p9 = pnand %p1554_p8, %p1789_p3 }
  0x12   : > { %s179_s5 = sshll.u32 %s170_s4, 4  ;;  %s167_s7 = scalar_lea.sflag [#allocation5], %s1805_s25  ;;  %s1820_s5 = int_to_ptr.vmem [resolvable:$true] %s179_s5 }
  0x13   : > { %s1610_s8 = scalar_lea.hbm %s1812_s30, 256  ;;  %p1612_p11 = pneg %p1816_p9 }
  0x14   : > { %p1611_p10 = scmp.ne.s32.totalorder %s1812_s30, %s1610_s8  ;;  %s1615_s11 = scalar_lea.hbm %s1970_s0, 512 }
  0x15   : > { %p1616_p0 = scmp.lt.u32.totalorder %s1812_s30, %s1970_s0  ;;  %p1617_p1 = scmp.lt.u32.totalorder %s1615_s11, %s1610_s8 }
  0x16   : > { %p1613_p12 = pnand %p1612_p11, %p1611_p10  ;;  %p1619_p3 = scmp.lt.u32.totalorder %s1610_s8, %s1812_s30 }
  0x17   : > { %p1618_p2 = por %p1617_p1, %p1616_p0 }
  0x18   : > { %p1614_p13 = pneg %p1613_p12 }
  0x19   : > { %p1620_p4 = por %p1619_p3, %p1618_p2 }
  0x1b   : > { %p1621_p5 = pnand %p1620_p4, %p1614_p13 }
  0x1d   : > { %1624 = shalt.err (!%p1621_p5)
}
  0x1e   : > { %s1625_s20 = scalar_lea.vmem %s1820_s5, 256  ;;  %s1726_s21 = smov [#allocation4]  }
  0x1f   : > { %p1626_p6 = scmp.ne.s32.totalorder %s1820_s5, %s1625_s20  ;;  %s1630_s22 = sshll.u32 %s1726_s21, 4  ;;  %s1631_s22 = int_to_ptr.vmem [resolvable:$false] %s1630_s22 }
  0x20   : > { %s1632_s26 = scalar_lea.vmem %s1631_s22, 512  ;;  %p1633_p12 = scmp.lt.s32.totalorder %s1820_s5, %s1631_s22 }
  0x21   : > { %p1628_p8 = pnand %p1626_p6, %p1612_p11  ;;  %p1634_p0 = scmp.lt.s32.totalorder %s1632_s26, %s1625_s20 }
  0x23   : > { %p1629_p10 = pneg %p1628_p8  ;;  %p1635_p1 = por %p1634_p0, %p1633_p12 }
  0x25   : > { %p1636_p2 = pnand %p1635_p1, %p1629_p10 }
  0x27   : > { %1639 = shalt.err (!%p1636_p2)
}
  0x28   : > { %s1727_s27 = smov 128   ;;  %s1728_s28 = smov 8  }
  0x29   : > { %1550 = dma.hbm_to_vmem [thread:$0]  (!%p1816_p9), %s1812_s30, 256, %s1820_s5, %s167_s7, %s1727_s27, %s1727_s27, %s1728_s28  }
  0x2a   : > { %p1420_p13 = scmp.ge.s32.totalorder %s1724_s17, 1  ;;  %p206_p3 = scmp.lt.s32.totalorder %s1724_s17, 3 }
  0x2b   : > { %s1418_s29 = sshll.u32 %s1805_s25, 3  ;;  %s1419_s8 = sshll.u32 %s1720_s16, 7 }
  0x2c   : > { %p1853_p4 = pnand %p1420_p13, %p206_p3  ;;  %s193_s9 = scalar_lea.vmem [#allocation6], %s1418_s29 }
  0x2d   : > { %s201_s10 = sshll.u32 %s193_s9, 4  ;;  %s1861_s18 = scalar_lea.hbm %s1971_s1, %s1419_s8  ;;  %s202_s10 = int_to_ptr.vmem [resolvable:$true] %s201_s10 }
  0x2e   : > { %s1978_s4 = scalar_select %p1853_p4, 1, 0 }
  0x2f   : > { %s190_s30 = scalar_lea.sflag [#allocation7], %s1805_s25  ;;  %s1640_s5 = scalar_lea.hbm %s1861_s18, 128 }
  0x30   : > { %p1641_p5 = scmp.ne.s32.totalorder %s1861_s18, %s1640_s5  ;;  %s1645_s21 = scalar_lea.hbm %s1971_s1, 256 }
  0x31   : > { %p1646_p10 = scmp.lt.u32.totalorder %s1861_s18, %s1971_s1  ;;  %p1647_p12 = scmp.lt.u32.totalorder %s1645_s21, %s1640_s5 }
  0x32   : > { %p1643_p6 = pnand %p1641_p5, %p1612_p11  ;;  %p1649_p1 = scmp.lt.u32.totalorder %s1640_s5, %s1861_s18 }
  0x33   : > { %p1648_p0 = por %p1647_p12, %p1646_p10 }
  0x34   : > { %p1644_p8 = pneg %p1643_p6 }
  0x35   : > { %p1650_p2 = por %p1649_p1, %p1648_p0 }
  0x37   : > { %p1651_p13 = pnand %p1650_p2, %p1644_p8 }
  0x39   : > { %1654 = shalt.err (!%p1651_p13)
}
  0x3a   : > { %s1655_s25 = scalar_lea.vmem %s202_s10, 128  ;;  %s1729_s27 = smov [#allocation6]  }
  0x3b   : > { %p1656_p3 = scmp.ne.s32.totalorder %s202_s10, %s1655_s25  ;;  %s1660_s28 = sshll.u32 %s1729_s27, 4  ;;  %s1661_s28 = int_to_ptr.vmem [resolvable:$false] %s1660_s28 }
  0x3c   : > { %s1662_s29 = scalar_lea.vmem %s1661_s28, 256  ;;  %p1663_p7 = scmp.lt.s32.totalorder %s202_s10, %s1661_s28 }
  0x3d   : > { %p1658_p5 = pnand %p1656_p3, %p1612_p11  ;;  %p1664_p4 = scmp.lt.s32.totalorder %s1662_s29, %s1655_s25 }
  0x3f   : > { %p1659_p6 = pneg %p1658_p5  ;;  %p1665_p10 = por %p1664_p4, %p1663_p7 }
  0x41   : > { %p1666_p12 = pnand %p1665_p10, %p1659_p6 }
  0x43   : > { %1669 = shalt.err (!%p1666_p12)
}
  0x44   : > { %1553 = dma.hbm_to_vmem [thread:$0]  (!%p1816_p9), %s1861_s18, 128, %s202_s10, %s190_s30  }
  0x45   : > { %p1979_p8 = scmp.ne.s32.totalorder %s1978_s4, 0 }
  0x46   : > { %s212_s8 = sand.u32 (!%p1979_p8), 1, %s1708_s13   ;;  %p1980_p11 = scmp.ne.s32.totalorder (!%p1979_p8), %s1976_s23, 0 }
  0x47   : > { %210 = sbr.rel (%p1979_p8) target bundleno = 374 (0x176), region = 32  ;;  %s1421_s9 = sshll.u32 (!%p1979_p8), %s212_s8, 4 }
  0x48   : > { %s213_s11 = scalar_lea.sflag (!%p1979_p8), [#allocation5], %s212_s8  ;;  %s216_s12 = scalar_lea.vmem (!%p1979_p8), [#allocation4], %s1421_s9 }
  0x4e   : > { %1695 = dma.done.wait (%p1980_p11), %s213_s11, 256  }
  0x4f   : > { %1697 = vsyncadd (%p1980_p11), %s213_s11, 4294967040  ;;  %s1422_s5 = sshll.u32 %s212_s8, 3  ;;  %s222_s7 = scalar_lea.sflag [#allocation7], %s212_s8 }
  0x50   : > { %s225_s6 = scalar_lea.vmem [#allocation6], %s1422_s5 }
  0x51   : > { %1699 = dma.done.wait (%p1980_p11), %s222_s7, 128  }
  0x52   : > { %1701 = vsyncadd (%p1980_p11), %s222_s7, 4294967168  ;;  %v1730_v0 = vmov 0.0   ;;  %vm1731_vm0 = vmmov 0   ;;  %vm289_vm1 = vcmask 261120   ;;  %v279_v1 = vld [vmem:[%s216_s12] sm:$0xff]  ;;  %v280_v7 = vld [vmem:[%s216_s12 + $0x8] sm:$0xff]  ;;  %v1270_v46 = vlaneseq }
  0x53   : > { %1461 = vmatprep.subr.mxu0 %v1730_v0  ;;  %1463 = vmatprep.mubr.msk.f32.mxu0 %vm1731_vm0, %v1730_v0  ;;  %v1425_v2 = vld [vmem:[%s1972_s2] ss:$0 sm:$0xff]  ;;  %v1426_v3 = vld [vmem:[%s1972_s2 + $0x2] ss:$0 sm:$0xff]  ;;  %v274_v8 = vld [vmem:[%s1972_s2 + $0x1] sm:$0x1] }
  0x54   : > { %v287_v4 = vmul.f32 %v1425_v2, %v279_v1  ;;  %v303_v5 = vmul.f32 %v1426_v3, %v279_v1  ;;  %v307_v6 = vld [vmem:[%s225_s6] sm:$0xff]  ;;  %v288_v10 = vmul.f32 %v1425_v2, %v280_v7  ;;  %v304_v11 = vmul.f32 %v1426_v3, %v280_v7  ;;  %p262_p7 = scmp.lt.s32.totalorder %s1716_s15, 1 }
  0x55   : > { %v313_v9 = vsel %vm289_vm1, %v307_v6, 0  ;;  %v310_v12 = vsel %vm289_vm1, %v274_v8, 0  ;;  %v1732_v39 = vmov 0   ;;  %vm296_vm2 = vcmask 7168  }
  0x56   : > { %v290_v13 = vsel %vm289_vm1, %v287_v4, 0.0  ;;  %305 = vst.msk [vmem:[#allocation3] sm:$0xff] %vm289_vm1, %v303_v5  ;;  %v1910_v14 = vand.u32 4294901760, %v313_v9  ;;  %v1912_v15 = vand.u32 4294901760, %v310_v12  ;;  %306 = vst.msk [vmem:[#allocation3 + $0x8] sm:$0xff] %vm289_vm1, %v304_v11  ;;  %v293_v16 = vsel %vm289_vm1, %v288_v10, 0.0  ;;  %1608 = vset.pattern.permute.xlu1 %v1732_v39  ;;  %1609 = vset.pattern.permute.xlu0 %v1732_v39 }
  0x57   : > { %291 = vadd.xlane.f32.xlu0 %v290_v13  ;;  %v1271_v47 = vshrl.u32 %v1270_v46, 7  ;;  %s1989_s15 = smov (!%p262_p7, %s1716_s15), 1  ;;  %vm1276_vm3 = vcmask 64512  }
  0x58   : > { %1462 = vmatpush3.xpose.msra.mxu0 %v1910_v14  ;;  %v382_v17 = vsub.f32 %v310_v12, %v1912_v15  ;;  %v393_v18 = vsub.f32 %v313_v9, %v1910_v14  ;;  %1491 = vmatprep.subr.mxu1 %v1910_v14  ;;  %s1430_s21 = sshll.u32 %s1989_s15, 4 }
  0x59   : > { %1466 = vmatprep.subr.mxu0 %v1730_v0  ;;  %1492 = vmatpush3.xpose.msra.mxu1 %v1910_v14  ;;  %v1272_v50 = vsub.s32 0, %v1271_v47  ;;  %s272_s25 = scalar_lea.vmem %s1973_s3, %s1430_s21 }
  0x5a   : > { %v383_v19 = vand.u32 4294901760, %v382_v17  ;;  %v394_v20 = vand.u32 4294901760, %v393_v18 }
  0x5b   : > { %294 = vadd.xlane.f32.xlu0 %v293_v16 }
  0x5c   : > { %v384_v21 = vsub.f32 %v382_v17, %v383_v19  ;;  %v395_v22 = vsub.f32 %v393_v18, %v394_v20 }
  0x5d   : > { %v761_v23 = vld [vmem:[#allocation3] sm:$0xff]  ;;  %v762_v27 = vld [vmem:[#allocation3 + $0x8] sm:$0xff] }
  0x5e   : > { %v385_v24 = vand.u32 4294901760, %v384_v21  ;;  %v396_v25 = vand.u32 4294901760, %v395_v22  ;;  %v776_v26 = vsel %vm289_vm1, %v761_v23, 0  ;;  %v779_v29 = vsel %vm289_vm1, %v762_v27, 0 }
  0x5f   : > { %v847_v28 = vand.u32 4294901760, %v776_v26  ;;  %v857_v30 = vand.u32 4294901760, %v779_v29 }
  0x60   : > { %1464 = vmatmul.mubr.f32.vlgmr.msra.gmra.mrb[0].mxu0 %v385_v24  ;;  %1496 = vmatprep.subr.mxu1 %v396_v25 }
  0x61   : > { %1467 = vmatpush3.xpose.msra.mxu0 %v396_v25  ;;  %1468 = vmatprep.mubr.msk.f32.mxu0 %vm1731_vm0, %v1730_v0  ;;  %v848_v31 = vsub.f32 %v776_v26, %v847_v28  ;;  %v858_v32 = vsub.f32 %v779_v29, %v857_v30 }
  0x62   : > { %1471 = vmatprep.subr.mxu0 %v1730_v0 }
  0x63   : > { %v849_v33 = vand.u32 4294901760, %v848_v31  ;;  %v859_v34 = vand.u32 4294901760, %v858_v32 }
  0x65   : > { %v850_v35 = vsub.f32 %v848_v31, %v849_v33  ;;  %v860_v36 = vsub.f32 %v858_v32, %v859_v34 }
  0x67   : > { %v851_v37 = vand.u32 4294901760, %v850_v35  ;;  %v861_v38 = vand.u32 4294901760, %v860_v36 }
  0x68   : > { %1469 = vmatmul.mubr.f32.vlgmr.msra.gmra.mrb[0].mxu0 %v1912_v15 }
  0x69   : > { %1493 = vmatprep.mubr.f32.mxu1 %v851_v37  ;;  %1472 = vmatpush3.xpose.msra.mxu0 %v393_v18 }
  0x6a   : > { %1494 = vmatmul.mubr.f32.vlgmr.msra.gmra.mrb[0].mxu1 %v861_v38  ;;  %1473 = vmatprep.mubr.msk.f32.mxu0 %vm1731_vm0, %v1730_v0 }
  0x6b   : > { %1497 = vmatpush3.xpose.msra.mxu1 %v396_v25  ;;  %1498 = vmatprep.mubr.f32.mxu1 %v847_v28 }
  0x6c   : > { %1476 = vmatprep.subr.mxu0 %v1730_v0  ;;  %1501 = vmatprep.subr.mxu1 %v393_v18 }
  0x70   : > { %1474 = vmatmul.mubr.f32.vlgmr.msra.gmra.mrb[0].mxu0 %v382_v17 }
  0x71   : > { %1477 = vmatpush3.xpose.msra.mxu0 %v1910_v14  ;;  %1478 = vmatprep.mubr.msk.f32.mxu0 %vm1731_vm0, %v1730_v0 }
  0x72   : > { %1499 = vmatmul.mubr.f32.vlgmr.msra.gmra.mrb[0].mxu1 %v857_v30  ;;  %1481 = vmatprep.subr.mxu0 %v1730_v0 }
  0x73   : > { %1502 = vmatpush3.xpose.msra.mxu1 %v393_v18  ;;  %1503 = vmatprep.mubr.f32.mxu1 %v848_v31 }
  0x74   : > { %1506 = vmatprep.subr.mxu1 %v1910_v14 }
  0x78   : > { %1479 = vmatmul.mubr.f32.vlgmr.msra.gmra.mrb[0].mxu0 %v383_v19 }
  0x79   : > { %1482 = vmatpush3.xpose.msra.mxu0 %v394_v20  ;;  %1483 = vmatprep.mubr.msk.f32.mxu0 %vm1731_vm0, %v1730_v0 }
  0x7a   : > { %1504 = vmatmul.mubr.f32.vlgmr.msra.gmra.mrb[0].mxu1 %v858_v32  ;;  %1486 = vmatprep.subr.mxu0 %v1730_v0 }
  0x7b   : > { %1507 = vmatpush3.xpose.msra.mxu1 %v1910_v14  ;;  %1508 = vmatprep.mubr.f32.mxu1 %v849_v33 }
  0x7c   : > { %1511 = vmatprep.subr.mxu1 %v394_v20 }
  0x80   : > { %1484 = vmatmul.mubr.f32.vlgmr.msra.gmra.mrb[0].mxu0 %v1912_v15 }
  0x81   : > { %1487 = vmatpush3.xpose.msra.mxu0 %v1910_v14  ;;  %1488 = vmatprep.mubr.msk.f32.mxu0 %vm1731_vm0, %v1730_v0 }
  0x82   : > { %1509 = vmatmul.mubr.f32.vlgmr.msra.gmra.mrb[0].mxu1 %v859_v34 }
  0x83   : > { %1512 = vmatpush3.xpose.msra.mxu1 %v394_v20  ;;  %1513 = vmatprep.mubr.f32.mxu1 %v847_v28 }
  0x84   : > { %1516 = vmatprep.subr.mxu1 %v1910_v14 }
  0x88   : > { %1489 = vmatmul.mubr.f32.vlgmr.msra.gmra.mrb[0].mxu0 %v1912_v15 }
  0x8a   : > { %1514 = vmatmul.mubr.f32.vlgmr.msra.gmra.mrb[0].mxu1 %v857_v30 }
  0x8b   : > { %1517 = vmatpush3.xpose.msra.mxu1 %v1910_v14  ;;  %1518 = vmatprep.mubr.f32.mxu1 %v847_v28 }
  0x92   : > { %1519 = vmatmul.mubr.f32.vlgmr.msra.gmra.mrb[0].mxu1 %v857_v30 }
  0xe4   : > { %v292_v40 = vpop.xlane.xlu0 %291 }
  0xe5   : > { %297 = vst.msk [vmem:[#allocation2] sm:$0xff] %vm296_vm2, %v292_v40 }
  0xe8   : > { %v295_v41 = vpop.xlane.xlu0 %294 }
  0xe9   : > { %298 = vst.msk [vmem:[#allocation2 + $0x8] sm:$0xff] %vm296_vm2, %v295_v41 }
  0xec   : > { %v763_v42 = vld [vmem:[#allocation2] sm:$0xff] }
  0xed   : > { %767 = vperm.xlu1 %1608, %v763_v42  }
  0xf0   : > { %v764_v43 = vld [vmem:[#allocation2 + $0x8] sm:$0xff] }
  0xf1   : > { %772 = vperm.xlu1 %1608, %v764_v43  }
 0x15b   : > { %v757_v44 = vpop.f32.mrb[0].mxu0 }
 0x15c   : > { %v1490_v45 = vpop.f32.mrb[1].mxu0  ;;  %v1273_v52 = vrot.slane %v757_v44, %v1272_v50 }
 0x165   : > { %v1520_v48 = vpop.f32.mrb[0].mxu1 }
 0x166   : > { %v1260_v49 = vpop.f32.mrb[1].mxu1 }
 0x16c   : > { %v768_v51 = vpop.permute.xlu1 %767 }
 0x16d   : > { %v1522_v53 = vadd.f32 %v1260_v49, %v768_v51 }
 0x16f   : > { %v1274_v54 = vadd.f32 %v1522_v53, %v1273_v52 }
 0x170   : > { %v773_v55 = vpop.permute.xlu1 %772 }
 0x171   : > { %1277 = vst.msk [vmem:[%s272_s25] sm:$0xff] %vm1276_vm3, %v1274_v54  ;;  %v1521_v56 = vadd.f32 %v1520_v48, %v773_v55 }
 0x173   : > { %v1275_v57 = vadd.f32 %v1521_v56, %v1273_v52 }
 0x175   : > { %1278 = vst.msk [vmem:[%s272_s25 + $0x8] sm:$0xff] %vm1276_vm3, %v1275_v57 }
 0x176 PF: > { %s19_s17 = sadd.s32 1, %s1724_s17   ;;  %s1981_s12 = smov %s1708_s13 }
 0x177   : > { %p16_p9 = scmp.ge.s32.totalorder %s19_s17, 4   ;;  %s1982_s13 = smov %s1712_s14 }
 0x178   : > { %s1983_s14 = smov %s1802_s24  ;;  %s1984_s15 = smov %s1720_s16 }
 0x179   : > { %s1985_s16 = smov %s1987_s19  ;;  %18 = sbr.rel (!%p16_p9) target bundleno = 6 (0x6), region = 89 }
 0x180   :  { %1315 = vsyncpa [#allocation5], 1 }
 0x181   :  { %1317 = vsyncpa [#allocation5 + $0x1], 1 }
 0x182   :  { %1318 = vsyncpa [#allocation7], 1 }
 0x183   :  { %1320 = vsyncpa [#allocation7 + $0x1], 1 }

</bundles_post_ra>
